<compile_context>
chip_gen: v7x
topology: tpu7x:2x2x1
jax: 0.10.0
libtpu: 0.0.40
codegen_flags: <defaults>
</compile_context>

<pallas_src>
import functools

import jax
import jax.numpy as jnp
from jax.experimental import pallas as pl
from jax.experimental.pallas import tpu as pltpu


# ----------------------------- kernels ------------------------------------ #

def _fused_kernel(x_ref, w1t_ref, w2t_ref, o_ref, *, inv_hw):
    """Single-pass SE: pool + MLP + rescale on a resident (bn, C, HW) block."""
    x = x_ref[...].astype(jnp.float32)                     # (bn, C, HW)
    pooled = jnp.sum(x, axis=-1) * inv_hw                  # (bn, C) f32
    h = jnp.maximum(
        jnp.dot(pooled, w1t_ref[...].astype(jnp.float32),
                preferred_element_type=jnp.float32), 0.0)  # (bn, hidden)
    z = jax.nn.sigmoid(
        jnp.dot(h, w2t_ref[...].astype(jnp.float32),
                preferred_element_type=jnp.float32))       # (bn, C)
    # Multiply in f32, cast the product once (matches fp32 reference closely).
    o_ref[...] = (x * z[:, :, None]).astype(o_ref.dtype)


def _pool_kernel(x_ref, sum_ref, *, hw_total, hw_tile, mask_edge):
    """Pass 1 (fallback): accumulate per-channel spatial sums.

    x_ref:   (1, c_tile, hw_tile) block of x in (N, C, HW) layout.
    sum_ref: (1, c_tile, 1) f32 accumulator, resident across the HW grid axis.
    """
    j = pl.program_id(2)

    @pl.when(j == 0)
    def _():
        sum_ref[...] = jnp.zeros_like(sum_ref)

    x = x_ref[...].astype(jnp.float32)

    if mask_edge:
        nj = pl.num_programs(2)

        # Mask only on the (single) partial edge tile; interior tiles stay
        # pure DMA + reduce (no iota/compare/select VPU work).
        @pl.when(j == nj - 1)
        def _():
            lane = jax.lax.broadcasted_iota(jnp.int32, x.shape, 2) + j * hw_tile
            xm = jnp.where(lane < hw_total, x, 0.0)
            sum_ref[...] += jnp.sum(xm, axis=-1, keepdims=True)

        @pl.when(j < nj - 1)
        def _():
            sum_ref[...] += jnp.sum(x, axis=-1, keepdims=True)
    else:
        sum_ref[...] += jnp.sum(x, axis=-1, keepdims=True)


def _scale_kernel(z_ref, x_ref, o_ref):
    """Pass 2 (fallback): o = x * z, z broadcast over the spatial (lane) axis."""
    x = x_ref[...].astype(jnp.float32)                     # (1, c_tile, hw_t)
    o_ref[...] = (x * z_ref[...]).astype(o_ref.dtype)      # z: (1, c_tile, 1) f32


# ----------------------------- helpers ------------------------------------ #

def _vmem_limit_bytes(block_bytes):
    # Double-buffered x-in + out ~= 4x block, plus weights/headroom.  Keep the
    # limit well under v7x's 64 MiB physical VMEM.
    need = 6 * block_bytes + (1 << 20)
    return int(min(48 * 1024 * 1024, max(32 * 1024 * 1024, need)))


def _choose_bn(n, slab_bytes, target_block_bytes):
    """Largest divisor of n with bn*slab <= budget; keep >=2 grid steps if n>=2."""
    max_bn = max(1, int(target_block_bytes // max(1, slab_bytes)))
    limit = min(n, max_bn)
    if n >= 2:
        limit = min(limit, n // 2)          # >= 2 grid steps (v7x megacore)
    limit = max(1, limit)
    for cand in range(limit, 0, -1):
        if n % cand == 0:
            return cand
    return 1


def _choose_two_pass_tiles(c, hw, itemsize, target_block_bytes):
    """(c_tile, hw_tile) for the fallback path, honoring the (8,128) rules."""
    c_tile = c if c <= 256 else 256                           # 256 % 8 == 0
    max_lanes = max(128, target_block_bytes // max(1, c_tile * itemsize))
    if hw <= max_lanes:
        hw_tile = hw                                          # full extent
    else:
        hw_tile = (max_lanes // 128) * 128                    # multiple of 128
    return int(c_tile), int(hw_tile)


# ----------------------------- drivers ------------------------------------ #

def _se_fused(x3, w1t, w2t, target_block_bytes):
    """Fused single-pass path: x3 (N, C, HW); w1t (C, hidden); w2t (hidden, C)."""
    n, c, hw = x3.shape
    hidden = w1t.shape[1]
    slab = c * hw * x3.dtype.itemsize
    bn = _choose_bn(n, slab, target_block_bytes)
    block_bytes = bn * slab

    return pl.pallas_call(
        functools.partial(_fused_kernel, inv_hw=1.0 / float(hw)),
        out_shape=jax.ShapeDtypeStruct((n, c, hw), x3.dtype),
        grid_spec=pltpu.PrefetchScalarGridSpec(
            num_scalar_prefetch=0,
            grid=(n // bn,),
            in_specs=[
                pl.BlockSpec((bn, c, hw), lambda i: (i, 0, 0)),     # x
                pl.BlockSpec((c, hidden), lambda i: (0, 0)),        # W1^T
                pl.BlockSpec((hidden, c), lambda i: (0, 0)),        # W2^T
            ],
            out_specs=pl.BlockSpec((bn, c, hw), lambda i: (i, 0, 0)),
        ),
        compiler_params=pltpu.CompilerParams(
            dimension_semantics=("parallel",),
            vmem_limit_bytes=_vmem_limit_bytes(block_bytes)),
    )(x3, w1t, w2t)


def _se_two_pass(x3, w1t, w2t, target_block_bytes):
    """Fallback when one (C, HW) image slab exceeds the block budget."""
    n, c, hw = x3.shape
    itemsize = x3.dtype.itemsize
    c_tile, hw_tile = _choose_two_pass_tiles(c, hw, itemsize, target_block_bytes)
    n_c = pl.cdiv(c, c_tile)
    n_hw = pl.cdiv(hw, hw_tile)
    block_bytes = c_tile * hw_tile * itemsize
    vmem_limit = _vmem_limit_bytes(block_bytes)
    mask_edge = (hw % hw_tile) != 0

    # Pass 1: per-channel spatial sums (reduction axis last -> "arbitrary").
    pooled_sum = pl.pallas_call(
        functools.partial(_pool_kernel, hw_total=hw, hw_tile=hw_tile,
                          mask_edge=mask_edge),
        out_shape=jax.ShapeDtypeStruct((n, c, 1), jnp.float32),
        grid_spec=pltpu.PrefetchScalarGridSpec(
            num_scalar_prefetch=0,
            grid=(n, n_c, n_hw),
            in_specs=[pl.BlockSpec((1, c_tile, hw_tile),
                                   lambda b, ci, j: (b, ci, j))],
            out_specs=pl.BlockSpec((1, c_tile, 1), lambda b, ci, j: (b, ci, 0)),
        ),
        compiler_params=pltpu.CompilerParams(
            dimension_semantics=("parallel", "parallel", "arbitrary"),
            vmem_limit_bytes=vmem_limit),
    )(x3)

    # Tiny squeeze/excite MLP in plain jnp (negligible FLOPs; avoids an extra
    # Pallas launch and the pooled->HBM->z->HBM round trip on the hot path).
    pooled = pooled_sum.reshape(n, c).astype(jnp.float32) * (1.0 / float(hw))
    h = jnp.maximum(pooled @ w1t.astype(jnp.float32), 0.0)
    z = jax.nn.sigmoid(h @ w2t.astype(jnp.float32)).reshape(n, c, 1)
    z = z.astype(jnp.float32)

    # Pass 2: lane-dense per-channel rescale, fully parallel grid.
    out = pl.pallas_call(
        _scale_kernel,
        out_shape=jax.ShapeDtypeStruct((n, c, hw), x3.dtype),
        grid_spec=pltpu.PrefetchScalarGridSpec(
            num_scalar_prefetch=0,
            grid=(n, n_c, n_hw),
            in_specs=[
                pl.BlockSpec((1, c_tile, 1), lambda b, ci, j: (b, ci, 0)),        # z
                pl.BlockSpec((1, c_tile, hw_tile), lambda b, ci, j: (b, ci, j)),  # x
            ],
            out_specs=pl.BlockSpec((1, c_tile, hw_tile),
                                   lambda b, ci, j: (b, ci, j)),
        ),
        compiler_params=pltpu.CompilerParams(
            dimension_semantics=("parallel", "parallel", "parallel"),
            vmem_limit_bytes=vmem_limit),
    )(z, x3)
    return out


def se_attention(x_nchw, w1, w2, *, target_block_bytes=4 * 1024 * 1024,
                 force_two_pass=False):
    """NCHW entry point matching the PyTorch module.

    x_nchw: (N, C, H, W)  (f32 or bf16; internal math is f32)
    w1: (hidden, C), w2: (C, hidden)  -- PyTorch Linear weight layouts.
    """
    n, c, h, w = x_nchw.shape
    hw = h * w
    x3 = x_nchw.reshape(n, c, hw)            # free reshape: native NCHW layout
    w1t = jnp.transpose(w1)                  # (C, hidden)
    w2t = jnp.transpose(w2)                  # (hidden, C)

    slab = c * hw * x_nchw.dtype.itemsize
    if (not force_two_pass) and slab <= target_block_bytes:
        out3 = _se_fused(x3, w1t, w2t, target_block_bytes)
    else:
        out3 = _se_two_pass(x3, w1t, w2t, target_block_bytes)
    return out3.reshape(n, c, h, w)


def se_attention_ref(x_nchw, w1, w2):
    """Pure-JAX reference matching the PyTorch forward (f32 math)."""
    xf = x_nchw.astype(jnp.float32)
    pooled = jnp.mean(xf, axis=(2, 3))                 # (N, C)
    hact = jnp.maximum(pooled @ w1.T.astype(jnp.float32), 0.0)
    z = jax.nn.sigmoid(hact @ w2.T.astype(jnp.float32))
    return xf * z[:, :, None, None]


# ------------------------------- main -------------------------------------- #

if __name__ == "__main__":
    key = jax.random.PRNGKey(0)

    def make_case(key, n, c, h, w, ratio, dtype):
        kx, k1, k2 = jax.random.split(key, 3)
        hidden = c // ratio
        x = jax.random.normal(kx, (n, c, h, w), dtype=jnp.float32).astype(dtype)
        w1 = (jax.random.normal(k1, (hidden, c), dtype=jnp.float32) * 0.1)
        w2 = (jax.random.normal(k2, (c, hidden), dtype=jnp.float32) * 0.1)
        return x, w1, w2

    k1, k2, k3 = jax.random.split(key, 3)

    # Case 1: fused single-pass path (N=2, C=16, 16x16, ratio=4).
    x, w1, w2 = make_case(k1, 2, 16, 16, 16, 4, jnp.float32)
    out = jax.block_until_ready(se_attention(x, w1, w2))
    ref = se_attention_ref(x, w1, w2)
    assert out.shape == x.shape
    assert jnp.allclose(out, ref, atol=1e-5, rtol=1e-5), "fused f32 mismatch"

    # Case 2: fused path with non-multiple spatial extent (13x13).
    x, w1, w2 = make_case(k2, 2, 16, 13, 13, 4, jnp.float32)
    out = jax.block_until_ready(se_attention(x, w1, w2))
    ref = se_attention_ref(x, w1, w2)
    assert jnp.allclose(out, ref, atol=1e-5, rtol=1e-5), "fused 13x13 mismatch"

    # Case 3: forced two-pass fallback (small block budget -> tiled HW with a
    # masked edge tile in the pooling pass).
    out = jax.block_until_ready(
        se_attention(x, w1, w2, target_block_bytes=8 * 1024,
                     force_two_pass=True))
    assert jnp.allclose(out, ref, atol=1e-5, rtol=1e-5), "two-pass mismatch"

    # Case 4: bf16 I/O (f32 accumulation / MLP / multiply inside the kernel).
    xb, w1b, w2b = make_case(k3, 2, 16, 16, 16, 4, jnp.bfloat16)
    outb = jax.block_until_ready(se_attention(xb, w1b, w2b))
    refb = se_attention_ref(xb, w1b, w2b)
    assert outb.dtype == jnp.bfloat16
    assert jnp.allclose(outb.astype(jnp.float32), refb, atol=5e-2, rtol=2e-2), \
        "bf16 mismatch"

    print("KERNEL_OK")
</pallas_src>

<mosaic_0001>
module attributes {stable_mosaic.version = 11 : i64} {
  func.func @_fused_kernel(%arg0: i32, %arg1: memref<1x16x256xf32, #tpu.memory_space<vmem>>, %arg2: memref<16x4xf32, #tpu.memory_space<vmem>>, %arg3: memref<4x16xf32, #tpu.memory_space<vmem>>, %arg4: memref<1x16x256xf32, #tpu.memory_space<vmem>>) attributes {dimension_semantics = [#tpu.dimension_semantics<parallel>], iteration_bounds = array<i64: 2>, scalar_prefetch = 0 : i64, scratch_operands = 0 : i64, tpu.core_type = #tpu.core_type<tc>, window_params = [{transform_indices = @transform_0, window_bounds = array<i64: 1, 16, 256>}, {pipeline_mode = #tpu.pipeline_mode<synchronous>, transform_indices = @transform_1, window_bounds = array<i64: 16, 4>}, {pipeline_mode = #tpu.pipeline_mode<synchronous>, transform_indices = @transform_2, window_bounds = array<i64: 4, 16>}, {transform_indices = @transform_3, window_bounds = array<i64: 1, 16, 256>}]} {
    %c0 = arith.constant 0 : index
    %c0_0 = arith.constant 0 : index
    %c0_1 = arith.constant 0 : index
    %0 = vector.load %arg1[%c0, %c0_0, %c0_1] : memref<1x16x256xf32, #tpu.memory_space<vmem>>, vector<1x16x256xf32>
    %cst = arith.constant dense<0.000000e+00> : vector<1x16xf32>
    %1 = vector.multi_reduction <add>, %0, %cst [2] : vector<1x16x256xf32> to vector<1x16xf32>
    %cst_2 = arith.constant 3.906250e-03 : f32
    %2 = vector.broadcast %cst_2 : f32 to vector<1x16xf32>
    %3 = arith.mulf %1, %2 : vector<1x16xf32>
    %c0_3 = arith.constant 0 : index
    %c0_4 = arith.constant 0 : index
    %4 = vector.load %arg2[%c0_3, %c0_4] : memref<16x4xf32, #tpu.memory_space<vmem>>, vector<16x4xf32>
    %cst_5 = arith.constant dense<0.000000e+00> : vector<1x4xf32>
    %5 = tpu.matmul %3, %4, %cst_5 {dimension_numbers = #tpu.dot_dimension_numbers<[1], [0], [0], [1], [0, 0, 1, 1], [], []>} : vector<1x16xf32>, vector<16x4xf32>, vector<1x4xf32> -> vector<1x4xf32>
    %cst_6 = arith.constant 0.000000e+00 : f32
    %6 = vector.broadcast %cst_6 : f32 to vector<1x4xf32>
    %7 = arith.maximumf %5, %6 : vector<1x4xf32>
    %c0_7 = arith.constant 0 : index
    %c0_8 = arith.constant 0 : index
    %8 = vector.load %arg3[%c0_7, %c0_8] : memref<4x16xf32, #tpu.memory_space<vmem>>, vector<4x16xf32>
    %cst_9 = arith.constant dense<0.000000e+00> : vector<1x16xf32>
    %9 = tpu.matmul %7, %8, %cst_9 {dimension_numbers = #tpu.dot_dimension_numbers<[1], [0], [0], [1], [0, 0, 1, 1], [], []>} : vector<1x4xf32>, vector<4x16xf32>, vector<1x16xf32> -> vector<1x16xf32>
    %10 = arith.negf %9 : vector<1x16xf32>
    %11 = math.exp %10 : vector<1x16xf32>
    %cst_10 = arith.constant 1.000000e+00 : f32
    %12 = vector.broadcast %cst_10 : f32 to vector<1x16xf32>
    %13 = arith.addf %12, %11 : vector<1x16xf32>
    %14 = arith.divf %12, %13 : vector<1x16xf32>
    %15 = vector.shape_cast %14 : vector<1x16xf32> to vector<1x16x1xf32>
    %16 = vector.broadcast %15 : vector<1x16x1xf32> to vector<1x16x256xf32>
    %17 = arith.mulf %0, %16 : vector<1x16x256xf32>
    %c0_11 = arith.constant 0 : index
    %c0_12 = arith.constant 0 : index
    %c0_13 = arith.constant 0 : index
    %18 = vector.load %arg4[%c0_11, %c0_12, %c0_13] : memref<1x16x256xf32, #tpu.memory_space<vmem>>, vector<1x16x256xf32>
    tpu.vector_store %arg4[%c0_11, %c0_12, %c0_13], %17 {strides = array<i32>} : memref<1x16x256xf32, #tpu.memory_space<vmem>>, vector<1x16x256xf32>,
    return
  }
  func.func @transform_0(%arg0: i32) -> (i32, i32, i32) {
    %c0_i32 = arith.constant 0 : i32
    %c0_i32_0 = arith.constant 0 : i32
    %c0_i32_1 = arith.constant 0 : i32
    return %arg0, %c0_i32, %c0_i32_0 : i32, i32, i32
  }
  func.func @transform_1(%arg0: i32) -> (i32, i32) {
    %c0_i32 = arith.constant 0 : i32
    %c0_i32_0 = arith.constant 0 : i32
    %c0_i32_1 = arith.constant 0 : i32
    return %c0_i32, %c0_i32_0 : i32, i32
  }
  func.func @transform_2(%arg0: i32) -> (i32, i32) {
    %c0_i32 = arith.constant 0 : i32
    %c0_i32_0 = arith.constant 0 : i32
    %c0_i32_1 = arith.constant 0 : i32
    return %c0_i32, %c0_i32_0 : i32, i32
  }
  func.func @transform_3(%arg0: i32) -> (i32, i32, i32) {
    %c0_i32 = arith.constant 0 : i32
    %c0_i32_0 = arith.constant 0 : i32
    %c0_i32_1 = arith.constant 0 : i32
    return %arg0, %c0_i32, %c0_i32_0 : i32, i32, i32
  }
}

</mosaic_0001>

<bundles_post_ra>
// kernel: tpu_custom_call.1
= control target key start
LH: loop header
LB: loop body
LE: loop exit
PB: predicated region body
PF: predicated region fallthrough
CT: control target
= control target key end

     0   :  { %8 = vsyncpa [#allocation3], 0  ;;  %s890_s0 = inlined_call_operand.hbm [shape: f32[2,16,256], index: 0, kind: input, shape index: {}]   ;;  %s891_s1 = inlined_call_operand.vmem [shape: f32[16,4], index: 1, kind: input, shape index: {}]   ;;  %s892_s2 = inlined_call_operand.vmem [shape: f32[4,16], index: 2, kind: input, shape index: {}]   ;;  %s893_s3 = inlined_call_operand.hbm [shape: f32[2,16,256], index: 3, kind: output, shape index: {}]  }
   0x1   :  { %10 = vsyncpa [#allocation3 + $0x1], 0 }
   0x2   :  { %11 = vsyncpa [#allocation4], 0 }
   0x3   :  { %13 = vsyncpa [#allocation4 + $0x1], 0  ;;  %s707_s12 = smov 0   ;;  %s709_s13 = smov 0  }
   0x4   :  { %s711_s14 = smov 0   ;;  %s713_s15 = smov 0  }
   0x5 LB: > { %s728_s16 = sadd.s32 4294967295, %s676_s15   ;;  %s483_s17 = sadd.s32 4294967294, %s676_s15   ;;  %s676_s15 = sphi %s713_s15, %s906_s15   ;;  %s672_s14 = sphi %s711_s14, %s905_s14   ;;  %s668_s13 = sphi %s709_s13, %s904_s13   ;;  %s664_s12 = sphi %s707_s12, %s903_s12  }
   0x6   : > { %s732_s18 = sadd.s32 1, %s676_s15   ;;  %s26_s19 = sadd.s32 1, %s672_s14 }
   0x7   : > { %s23_s20 = ssub.s32 %s676_s15, %s732_s18  ;;  %p33_p0 = scmp.ne.s32.totalorder %s672_s14, %s668_s13 }
   0x8   : > { %p24_p1 = scmp.eq.s32.totalorder %s23_s20, 0  ;;  %p34_p2 = scmp.eq.s32.totalorder %s676_s15, 0 }
   0x9   : > { %p39_p3 = scmp.ne.s32.totalorder %s668_s13, %s664_s12  ;;  %p40_p4 = scmp.eq.s32.totalorder %s728_s16, 0 }
   0xa   : > { %s744_s21 = scalar_select %p24_p1, %s672_s14, %s26_s19  }
   0xb   : > { %p746_p5 = por %p34_p2, %p33_p0  ;;  %p750_p6 = por %p40_p4, %p39_p3 }
   0xc   : > { %p105_p7 = scmp.eq.s32.totalorder %s728_s16, 1  ;;  %p111_p8 = scmp.eq.s32.totalorder %s483_s17, 1 }
   0xd   : > { %p535_p10 = scmp.lt.s32.totalorder %s676_s15, 2  ;;  %s137_s26 = sand.u32 1, %s672_s14  }
   0xe   : > { %p757_p11 = por %p105_p7, %p33_p0  ;;  %p761_p12 = por %p111_p8, %p39_p3 }
   0xf   : > { %s501_s27 = sshll.u32 %s676_s15, 9  ;;  %s486_s28 = sshll.u32 %s137_s26, 5 }
  0x10   : > { %s897_s24 = scalar_select %p757_p11, 1, 0 }
  0x11   : > { %s898_s25 = scalar_select %p761_p12, 1, 0 }
  0x12   : > { %s770_s4 = scalar_lea.hbm %s890_s0, %s501_s27  ;;  %s141_s5 = scalar_lea.vmem [#allocation2], %s486_s28 }
  0x13   : > { %s148_s6 = sshll.u32 %s141_s5, 4  ;;  %p774_p13 = pnand %p535_p10, %p746_p5  ;;  %s778_s6 = int_to_ptr.vmem [resolvable:$true] %s148_s6 }
  0x14   : > { %s780_s8 = scalar_lea.sflag [#allocation3], %s137_s26  ;;  %s580_s9 = scalar_lea.hbm %s770_s4, 512 }
  0x15   : > { %p581_p0 = scmp.ne.s32.totalorder %s770_s4, %s580_s9  ;;  %p582_p1 = pneg %p774_p13 }
  0x16   : > { %s585_s17 = scalar_lea.hbm %s890_s0, 1024  ;;  %p586_p4 = scmp.lt.u32.totalorder %s770_s4, %s890_s0 }
  0x17   : > { %p583_p2 = pnand %p582_p1, %p581_p0  ;;  %p587_p5 = scmp.lt.u32.totalorder %s585_s17, %s580_s9 }
  0x18   : > { %p589_p8 = scmp.lt.u32.totalorder %s580_s9, %s770_s4 }
  0x19   : > { %p584_p3 = pneg %p583_p2  ;;  %p588_p7 = por %p587_p5, %p586_p4 }
  0x1b   : > { %p590_p10 = por %p589_p8, %p588_p7 }
  0x1d   : > { %p591_p9 = pnand %p590_p10, %p584_p3 }
  0x1f   : > { %594 = shalt.err (!%p591_p9)
}
  0x20   : > { %s595_s22 = scalar_lea.vmem %s778_s6, 512  ;;  %s678_s26 = smov [#allocation2]  }
  0x21   : > { %p596_p0 = scmp.ne.s32.totalorder %s778_s6, %s595_s22  ;;  %s600_s27 = sshll.u32 %s678_s26, 4  ;;  %s601_s27 = int_to_ptr.vmem [resolvable:$false] %s600_s27 }
  0x22   : > { %s602_s28 = scalar_lea.vmem %s601_s27, 1024  ;;  %p603_p11 = scmp.lt.s32.totalorder %s778_s6, %s601_s27 }
  0x23   : > { %p598_p2 = pnand %p596_p0, %p582_p1  ;;  %p604_p4 = scmp.lt.s32.totalorder %s602_s28, %s595_s22 }
  0x25   : > { %p599_p12 = pneg %p598_p2  ;;  %p605_p5 = por %p604_p4, %p603_p11 }
  0x27   : > { %p606_p7 = pnand %p605_p5, %p599_p12 }
  0x29   : > { %609 = shalt.err (!%p606_p7)
}
  0x2a   : > { %s679_s29 = smov 256   ;;  %s680_s30 = smov 16  }
  0x2b   : > { %530 = dma.hbm_to_vmem [thread:$0]  (!%p774_p13), %s770_s4, 512, %s778_s6, %s780_s8, %s679_s29, %s679_s29, %s680_s30  }
  0x2c   : > { %p489_p9 = scmp.ge.s32.totalorder %s676_s15, 1  ;;  %p156_p1 = scmp.lt.s32.totalorder %s676_s15, 3 }
  0x2e   : > { %p157_p3 = pnand %p489_p9, %p156_p1 }
  0x2f   : > { %s811_s5 = sand.u32 (!%p157_p3), 1, %s668_s13  }
  0x30   : > { %160 = sbr.rel (%p157_p3) target bundleno = 800 (0x320), region = 32  ;;  %s490_s9 = sshll.u32 (!%p157_p3), %s811_s5, 5 }
  0x31   : > { %s163_s10 = scalar_lea.sflag (!%p157_p3), [#allocation3], %s811_s5  ;;  %s166_s11 = scalar_lea.vmem (!%p157_p3), [#allocation2], %s490_s9 }
  0x37   : > { %655 = dma.done.wait (%p750_p6), %s163_s10, 512  }
  0x38   : > { %657 = vsyncadd (%p750_p6), %s163_s10, 4294966784  ;;  %v189_v0 = vld [vmem:[%s166_s11] sm:$0xff]  ;;  %v190_v1 = vld [vmem:[%s166_s11 + $0x8] sm:$0xff]  ;;  %v681_v9 = vmov 0.0|0.0   ;;  %vm682_vm0 = vmmov 0   ;;  %v683_v10 = vmov 0.0   ;;  %v205_v11 = vlaneseq }
  0x39   : > { %v821_v2 = vld [vmem:[%s166_s11 + $0x10] sm:$0xff]  ;;  %v193_v3 = vadd.f32 %v190_v1, %v189_v0  ;;  %v823_v4 = vld [vmem:[%s166_s11 + $0x18] sm:$0xff]  ;;  %v201_v6 = vld [vmem:[%s891_s1] sm:$0xff]  ;;  %520 = vmatprep.subr.bf16.mxu0 %v681_v9  ;;  %512 = vmatprep.mubr.msk.f32.mxu0 %vm682_vm0, %v683_v10  ;;  %vm216_vm1 = vcmask 130112   ;;  %vm218_vm2 = vcmask 130048   ;;  %vm297_vm3 = vcmask 1043456  }
  0x3a   : > { %v196_v5 = vadd.f32 %v823_v4, %v821_v2  ;;  %v202_v7 = vld [vmem:[%s891_s1 + $0x8] sm:$0xff]  ;;  %515 = vmatprep.subr.mxu1 %v683_v10  ;;  %517 = vmatprep.mubr.msk.f32.mxu1 %vm682_vm0, %v683_v10  ;;  %v206_v12 = vand.u32 127, %v205_v11  ;;  %v208_v13 = vshrl.u32 %v205_v11, 7  ;;  %v292_v24 = vld [vmem:[%s892_s2] sm:$0xf]  ;;  %vm293_vm4 = vcmask 31744  }
  0x3b   : > { %194 = vadd.xlane.f32.xlu0 %v193_v3  ;;  %v521_v8 = vpack.c.bf16 %v202_v7, %v201_v6  ;;  %516 = vmatpush3.msk.msra.mxu1 %vm297_vm3, %v292_v24  ;;  %s188_s19 = scalar_lea.vmem [#allocation5], %s490_s9  ;;  %s502_s22 = sshll.u32 %s728_s16, 9 }
  0x3c   : > { %v211_v14 = vadd.s32 4294967288, %v206_v12  ;;  %v209_v16 = vsub.s32 %v206_v12, %v208_v13  ;;  %v379_v33 = vsub.s32 0, %v208_v13  ;;  %s410_s20 = sshll.u32 %s188_s19, 4  ;;  %s844_s28 = scalar_lea.hbm %s893_s3, %s502_s22  ;;  %s839_s20 = int_to_ptr.vmem [resolvable:$true] %s410_s20 }
  0x3d   : > { %522 = vmatpush3.bf16.msra.mxu0 %v521_v8  ;;  %s397_s16 = scalar_lea.sflag [#allocation4], %s811_s5  ;;  %s610_s29 = scalar_lea.vmem %s839_s20, 512 }
  0x3e   : > { %v214_v18 = vsub.s32 %v211_v14, %v208_v13  ;;  %p611_p6 = scmp.ne.s32.totalorder %s839_s20, %s610_s29  ;;  %p900_p11 = scmp.ne.s32.totalorder %s897_s24, 0 }
  0x3f   : > { %197 = vadd.xlane.f32.xlu0 %v196_v5  ;;  %s684_s30 = smov [#allocation5]  }
  0x40   : > { %p612_p12 = pnand %p611_p6, %p900_p11  ;;  %s614_s9 = sshll.u32 %s684_s30, 4  ;;  %s615_s9 = int_to_ptr.vmem [resolvable:$false] %s614_s9 }
  0x41   : > { %s616_s10 = scalar_lea.vmem %s615_s9, 1024  ;;  %p617_p8 = scmp.lt.s32.totalorder %s839_s20, %s615_s9 }
  0x42   : > { %p613_p13 = pneg %p612_p12  ;;  %p618_p10 = scmp.lt.s32.totalorder %s616_s10, %s610_s29 }
  0x44   : > { %p619_p0 = por %p618_p10, %p617_p8 }
  0x46   : > { %p620_p2 = pnand %p619_p0, %p613_p13 }
  0xc8   : > { %v195_v15 = vpop.xlane.xlu0 %194 }
  0xc9   : > { %v199_v17 = vmul.f32 0.00390625, %v195_v15 }
  0xcb   : > { %v210_v21 = vrot.slane %v199_v17, %v209_v16 }
  0xcc   : > { %v198_v19 = vpop.xlane.xlu0 %197 }
  0xcd   : > { %v200_v20 = vmul.f32 0.00390625, %v198_v19 }
  0xcf   : > { %v215_v22 = vrot.slane %v200_v20, %v214_v18 }
  0xd1   : > { %v217_v23 = vsel %vm216_vm1, %v215_v22, %v210_v21 }
  0xd2   : > { %513 = vmatmul.mubr.msk.f32.vlgmr.msra.gmra.mrb[0].mxu0 %vm218_vm2, %v217_v23 }
 0x1a5   : > { %v287_v25 = vpop.f32.mrb[0].mxu0 }
 0x1a6   : > { %v291_v26 = vmax.f32 %v287_v25, 0.0  ;;  %v514_v27 = vpop.f32.mrb[1].mxu0 }
 0x1a8   : > { %518 = vmatmul.mubr.msk.f32.vlgmr.msra.gmra.mrb[0].mxu1 %vm293_vm4, %v291_v26 }
 0x27b   : > { %v367_v28 = vpop.f32.mrb[0].mxu1 }
 0x27c   : > { %v495_v29 = vmul.f32 -1.442695, %v367_v28  ;;  %v519_v30 = vpop.f32.mrb[1].mxu1 }
 0x27e   : > { %576 = vpow2.f32 %v495_v29 }
 0x288   : > { %v577_v31 = vpop.eup %576 }
 0x289   : > { %v374_v32 = vadd.f32 1.0, %v577_v31 }
 0x28b   : > { %578 = vrcp.f32 %v374_v32 }
 0x295   : > { %v579_v34 = vpop.eup %578 }
 0x296   : > { %v380_v35 = vrot.slane %v579_v34, %v379_v33 }
 0x298   : > { %382 = vbcast.lane.b32.xlu1 %v380_v35, 256 }
 0x29c   : > { %386 = vbcast.lane.b32.xlu1 %v380_v35, 264 }
 0x30a   : > { %v383_v36 = vpop.permute.xlu1 %382 }
 0x30b   : > { %v388_v37 = vmul.f32 %v383_v36, %v189_v0  ;;  %v389_v38 = vmul.f32 %v383_v36, %v190_v1 }
 0x30d   : > { %392 = vst [vmem:[%s188_s19] sm:$0xff] %v388_v37  ;;  %393 = vst [vmem:[%s188_s19 + $0x8] sm:$0xff] %v389_v38 }
 0x30e   : > { %v387_v39 = vpop.permute.xlu1 %386 }
 0x30f   : > { %v390_v40 = vmul.f32 %v387_v39, %v821_v2  ;;  %v391_v41 = vmul.f32 %v387_v39, %v823_v4 }
 0x311   : > { %394 = vst [vmem:[%s188_s19 + $0x10] sm:$0xff] %v390_v40  ;;  %395 = vst [vmem:[%s188_s19 + $0x18] sm:$0xff] %v391_v41 }
 0x312   : > { %623 = shalt.err (!%p620_p2)
}
 0x313   : > { %s624_s11 = scalar_lea.hbm %s844_s28, 512  ;;  %s628_s7 = scalar_lea.hbm %s893_s3, 1024 }
 0x314   : > { %p625_p4 = scmp.ne.s32.totalorder %s844_s28, %s624_s11  ;;  %p629_p9 = scmp.lt.u32.totalorder %s844_s28, %s893_s3 }
 0x315   : > { %p630_p1 = scmp.lt.u32.totalorder %s628_s7, %s624_s11  ;;  %p632_p6 = scmp.lt.u32.totalorder %s624_s11, %s844_s28 }
 0x316   : > { %p626_p5 = pnand %p625_p4, %p900_p11 }
 0x317   : > { %p631_p3 = por %p630_p1, %p629_p9 }
 0x318   : > { %p627_p7 = pneg %p626_p5 }
 0x319   : > { %p633_p12 = por %p632_p6, %p631_p3 }
 0x31b   : > { %p634_p13 = pnand %p633_p12, %p627_p7 }
 0x31d   : > { %637 = shalt.err (!%p634_p13)
}
 0x31e   : > { %s685_s17 = smov 256   ;;  %s686_s19 = smov 16  }
 0x31f   : > { %525 = dma.vmem_to_hbm [thread:$0]  (%p900_p11), %s839_s20, 512, %s844_s28, %s397_s16, %s685_s17, %s685_s17, %s686_s19  }
 0x320 PF: > { %s425_s22 = sand.u32 1, %s664_s12   ;;  %p901_p8 = scmp.ne.s32.totalorder %s898_s25, 0 }
 0x321   : > { %p902_p10 = scmp.ge.s32.totalorder %s676_s15, 2  ;;  %s426_s26 = scalar_lea.sflag [#allocation4], %s425_s22 }
 0x323   : > { %p532_p0 = pnand %p902_p10, %p901_p8 }
 0x325   : > { %659 = dma.done.wait (!%p532_p0), %s426_s26, 512  }
 0x326   : > { %661 = vsyncadd (!%p532_p0), %s426_s26, 4294966784  ;;  %p16_p2 = scmp.ge.s32.totalorder %s732_s18, 4   ;;  %s903_s12 = smov %s668_s13 }
 0x327   : > { %s904_s13 = smov %s672_s14  ;;  %s905_s14 = smov %s744_s21 }
 0x328   : > { %s906_s15 = smov %s732_s18  ;;  %18 = sbr.rel (!%p16_p2) target bundleno = 5 (0x5), region = 77 }
 0x32f   :  { %431 = vsyncpa [#allocation3], 1 }
 0x330   :  { %433 = vsyncpa [#allocation3 + $0x1], 1 }
 0x331   :  { %434 = vsyncpa [#allocation4], 1 }
 0x332   :  { %436 = vsyncpa [#allocation4 + $0x1], 1 }

</bundles_post_ra>
